<compile_context>
chip_gen: v7x
topology: tpu7x:2x2x1
jax: 0.10.0
libtpu: 0.0.40
codegen_flags: <defaults>
</compile_context>

<pallas_src>
import jax
import jax.numpy as jnp
from jax import lax
from jax.experimental import pallas as pl
from jax.experimental.pallas import tpu as pltpu


def _round_up(x, m):
    return ((x + m - 1) // m) * m


def _cdiv(a, b):
    return -(-a // b)


def _make_col_sumsq_kernel(rows, block_rows, blocks_total, steps, num_splits):
    """Kernel for a packed (rows, W) array.

    Grid cell (p, i) accumulates the per-column sum of squares of row block
    blk = num_splits * i + p into the p-th resident (8, W) output block.
    The final 8->1 sublane reduction and the p-reduction happen in the wrapper.
    """
    rem = rows - (blocks_total - 1) * block_rows      # valid rows in last block
    has_partial = rem != block_rows                   # static
    has_dup = num_splits * steps > blocks_total       # static (at most 1 extra)

    def kernel(d_ref, acc_ref):
        p = pl.program_id(0)
        i = pl.program_id(1)

        @pl.when(i == 0)
        def _():
            acc_ref[...] = jnp.zeros_like(acc_ref)

        blk = i * num_splits + p
        if has_dup:
            blk = jnp.minimum(blk, blocks_total - 1)
            # The single over-covered (clamped) step must not accumulate.
            active = jnp.logical_not(
                jnp.logical_and(p == num_splits - 1, i == steps - 1))

        def accum(mask_rows):
            x = d_ref[...].astype(jnp.float32)
            if mask_rows:
                rid = lax.broadcasted_iota(jnp.int32, x.shape, 0)
                x = jnp.where(rid < rem, x, 0.0)
            x = x * x
            # Fold rows into 8 sublanes with vreg-aligned VPU adds; the
            # cross-sublane 8->1 reduction is deferred to the wrapper.
            x = x.reshape(block_rows // 8, 8, x.shape[-1]).sum(axis=0)
            acc_ref[...] += x

        if has_partial:
            is_last = blk == blocks_total - 1
            cond_main = jnp.logical_not(is_last)
            cond_last = is_last
            if has_dup:
                cond_main = jnp.logical_and(active, cond_main)
                cond_last = jnp.logical_and(active, cond_last)

            @pl.when(cond_main)
            def _():
                accum(False)

            @pl.when(cond_last)
            def _():
                accum(True)
        elif has_dup:
            @pl.when(active)
            def _():
                accum(False)
        else:
            accum(False)

    return kernel


def _per_buffer_target_bytes():
    # Large DMA tiles to amortize the ~0.35 us/grid-step overhead, while leaving
    # headroom on every generation (v7x has only 64 MiB VMEM per TensorCore).
    vmem_bytes = 128 * 1024 * 1024
    try:
        vmem_bytes = int(getattr(pltpu.get_tpu_info(),
                                 "vmem_capacity_bytes", vmem_bytes))
    except Exception:
        pass
    return int(max(2 * 1024 * 1024, min(12 * 1024 * 1024, vmem_bytes // 8)))


def d_constraint1(d):
    """JAX/Pallas equivalent of D_constraint1.forward(d) for d: [N, C]."""
    n, c = d.shape

    # ---- Lane packing: view (N, C) as (N//G, G*C) so rows are lane-dense. ----
    if c >= 128:
        g = 1
    elif 128 % c == 0:
        g = 128 // c                      # G*C == 128 exactly
    else:
        g = _cdiv(128, c)                 # G*C >= 128 (full-width block is legal)
    if g > n:
        g = 1

    n_main = (n // g) * g
    width = g * c

    if n_main == n:
        dp = d.reshape(n // g, width)     # contiguous row-major reshape (bitcast)
        tail = None
    else:
        # TODO(synk): this prefix slice materializes a copy when N % G != 0; a
        # fully copy-free ragged path would need per-lane-group masking.
        dp = d[:n_main].reshape(n_main // g, width)
        tail = d[n_main:]

    rows = dp.shape[0]
    itemsize = dp.dtype.itemsize

    # ---- Tile sizing: dtype-aware target, keep >= ~8 blocks, rows % 8 == 0. ----
    tgt_bytes = _per_buffer_target_bytes()
    tgt_rows = max(8, ((tgt_bytes // (width * itemsize)) // 8) * 8)
    cap_rows = max(8, _round_up(_cdiv(rows, 8), 8))   # at least ~8 grid steps
    block_rows = min(tgt_rows, cap_rows)

    blocks_total = _cdiv(rows, block_rows)
    num_splits = 2 if blocks_total >= 2 else 1        # both TCs on v7x
    steps = _cdiv(blocks_total, num_splits)

    if num_splits * steps > blocks_total:
        def in_index(p, i):
            return (jnp.minimum(i * num_splits + p, blocks_total - 1), 0)
    else:
        def in_index(p, i):
            return (i * num_splits + p, 0)

    kernel = _make_col_sumsq_kernel(rows, block_rows, blocks_total, steps,
                                    num_splits)

    acc = pl.pallas_call(
        kernel,
        out_shape=jax.ShapeDtypeStruct((num_splits * 8, width), jnp.float32),
        grid=(num_splits, steps),
        in_specs=[pl.BlockSpec((block_rows, width), in_index)],
        out_specs=pl.BlockSpec((8, width), lambda p, i: (p, 0)),
        compiler_params=pltpu.CompilerParams(
            dimension_semantics=("parallel", "arbitrary"),
            vmem_limit_bytes=int(2 * tgt_bytes + (16 << 20)),
        ),
    )(dp)

    # ---- O(C) epilogue in the wrapper. ----
    col_sumsq = acc.sum(axis=0)                        # (width,)  8->1 + p-reduce
    col_sumsq = col_sumsq.reshape(g, c).sum(axis=0)    # un-pack lanes -> (C,)
    if tail is not None:
        col_sumsq = col_sumsq + jnp.sum(tail.astype(jnp.float32) ** 2, axis=0)

    dev = col_sumsq - 1.0
    return 0.001 * jnp.sqrt(jnp.sum(dev * dev))


if __name__ == "__main__":
    key = jax.random.PRNGKey(0)
    N, C = 16, 8
    d = jax.random.normal(key, (N, C), dtype=jnp.float32)

    loss = jax.jit(d_constraint1)(d)
    jax.block_until_ready(loss)

    # Pure-JAX reference: exact same math as the PyTorch module.
    eye = jnp.eye(C, dtype=jnp.float32)
    ref = 0.001 * jnp.linalg.norm(jnp.matmul(d.T, d) * eye - eye)
    assert jnp.allclose(loss, ref, rtol=1e-5, atol=1e-6), (loss, ref)

    print("KERNEL_OK")
</pallas_src>

<mosaic_0001>
module attributes {stable_mosaic.version = 11 : i64} {
  func.func @kernel(%arg0: i32, %arg1: i32, %arg2: memref<8x128xf32, #tpu.memory_space<vmem>>, %arg3: memref<8x128xf32, #tpu.memory_space<vmem>>) attributes {dimension_semantics = [#tpu.dimension_semantics<parallel>, #tpu.dimension_semantics<arbitrary>], iteration_bounds = array<i64: 1, 1>, scalar_prefetch = 0 : i64, scratch_operands = 0 : i64, tpu.core_type = #tpu.core_type<tc>, window_params = [{transform_indices = @transform_0, window_bounds = array<i64: 8, 128>}, {transform_indices = @transform_1, window_bounds = array<i64: 8, 128>}]} {
    %c0_i32 = arith.constant 0 : i32
    %0 = arith.cmpi eq, %arg1, %c0_i32 : i32
    %1 = arith.extui %0 : i1 to i32
    %c0_i32_0 = arith.constant 0 : i32
    %2 = arith.cmpi ne, %1, %c0_i32_0 : i32
    scf.if %2 {
      %cst = arith.constant 0.000000e+00 : f32
      %11 = vector.broadcast %cst : f32 to vector<8x128xf32>
      %c0 = arith.constant 0 : index
      %c0_4 = arith.constant 0 : index
      %12 = vector.load %arg3[%c0, %c0_4] : memref<8x128xf32, #tpu.memory_space<vmem>>, vector<8x128xf32>
      tpu.vector_store %arg3[%c0, %c0_4], %11 {strides = array<i32>} : memref<8x128xf32, #tpu.memory_space<vmem>>, vector<8x128xf32>,
    } else {
    }
    %c1_i32 = arith.constant 1 : i32
    %3 = arith.muli %arg1, %c1_i32 : i32
    %4 = arith.addi %3, %arg0 : i32
    %c0_i32_1 = arith.constant 0 : i32
    %5 = arith.cmpi eq, %4, %c0_i32_1 : i32
    %true = arith.constant true
    %6 = arith.xori %5, %true : i1
    %7 = arith.extui %6 : i1 to i32
    %c0_i32_2 = arith.constant 0 : i32
    %8 = arith.cmpi ne, %7, %c0_i32_2 : i32
    scf.if %8 {
      %c0 = arith.constant 0 : index
      %c0_4 = arith.constant 0 : index
      %11 = vector.load %arg2[%c0, %c0_4] : memref<8x128xf32, #tpu.memory_space<vmem>>, vector<8x128xf32>
      %12 = arith.mulf %11, %11 : vector<8x128xf32>
      %13 = vector.shape_cast %12 : vector<8x128xf32> to vector<1x8x128xf32>
      %cst = arith.constant dense<0.000000e+00> : vector<8x128xf32>
      %14 = vector.multi_reduction <add>, %13, %cst [0] : vector<1x8x128xf32> to vector<8x128xf32>
      %c0_5 = arith.constant 0 : index
      %c0_6 = arith.constant 0 : index
      %15 = vector.load %arg3[%c0_5, %c0_6] : memref<8x128xf32, #tpu.memory_space<vmem>>, vector<8x128xf32>
      %16 = arith.addf %15, %14 : vector<8x128xf32>
      %c0_7 = arith.constant 0 : index
      %c0_8 = arith.constant 0 : index
      %17 = vector.load %arg3[%c0_7, %c0_8] : memref<8x128xf32, #tpu.memory_space<vmem>>, vector<8x128xf32>
      tpu.vector_store %arg3[%c0_7, %c0_8], %16 {strides = array<i32>} : memref<8x128xf32, #tpu.memory_space<vmem>>, vector<8x128xf32>,
    } else {
    }
    %9 = arith.extui %5 : i1 to i32
    %c0_i32_3 = arith.constant 0 : i32
    %10 = arith.cmpi ne, %9, %c0_i32_3 : i32
    scf.if %10 {
      %c0 = arith.constant 0 : index
      %c0_4 = arith.constant 0 : index
      %11 = vector.load %arg2[%c0, %c0_4] : memref<8x128xf32, #tpu.memory_space<vmem>>, vector<8x128xf32>
      %12 = tpu.iota {dimensions = array<i32: 0>} : vector<8x128xi32>
      %c1_i32_5 = arith.constant 1 : i32
      %13 = vector.broadcast %c1_i32_5 : i32 to vector<8x128xi32>
      %14 = arith.cmpi slt, %12, %13 : vector<8x128xi32>
      %cst = arith.constant 0.000000e+00 : f32
      %15 = vector.broadcast %cst : f32 to vector<8x128xf32>
      %16 = arith.select %14, %11, %15 : vector<8x128xi1>, vector<8x128xf32>
      %17 = arith.mulf %16, %16 : vector<8x128xf32>
      %18 = vector.shape_cast %17 : vector<8x128xf32> to vector<1x8x128xf32>
      %cst_6 = arith.constant dense<0.000000e+00> : vector<8x128xf32>
      %19 = vector.multi_reduction <add>, %18, %cst_6 [0] : vector<1x8x128xf32> to vector<8x128xf32>
      %c0_7 = arith.constant 0 : index
      %c0_8 = arith.constant 0 : index
      %20 = vector.load %arg3[%c0_7, %c0_8] : memref<8x128xf32, #tpu.memory_space<vmem>>, vector<8x128xf32>
      %21 = arith.addf %20, %19 : vector<8x128xf32>
      %c0_9 = arith.constant 0 : index
      %c0_10 = arith.constant 0 : index
      %22 = vector.load %arg3[%c0_9, %c0_10] : memref<8x128xf32, #tpu.memory_space<vmem>>, vector<8x128xf32>
      tpu.vector_store %arg3[%c0_9, %c0_10], %21 {strides = array<i32>} : memref<8x128xf32, #tpu.memory_space<vmem>>, vector<8x128xf32>,
    } else {
    }
    return
  }
  func.func @transform_0(%arg0: i32, %arg1: i32) -> (i32, i32) {
    %c1_i32 = arith.constant 1 : i32
    %0 = arith.muli %arg1, %c1_i32 : i32
    %1 = arith.addi %0, %arg0 : i32
    %c0_i32 = arith.constant 0 : i32
    %c0_i32_0 = arith.constant 0 : i32
    return %1, %c0_i32 : i32, i32
  }
  func.func @transform_1(%arg0: i32, %arg1: i32) -> (i32, i32) {
    %c0_i32 = arith.constant 0 : i32
    %c0_i32_0 = arith.constant 0 : i32
    return %arg0, %c0_i32 : i32, i32
  }
}

</mosaic_0001>

<bundles_post_ra>
// kernel: d_constraint1.1
= control target key start
LH: loop header
LB: loop body
LE: loop exit
PB: predicated region body
PF: predicated region fallthrough
CT: control target
= control target key end

     0   :  { %s92_s0 = inlined_call_operand.vmem [shape: f32[1,128], index: 0, kind: input, shape index: {}]   ;;  %s93_s1 = inlined_call_operand.vmem [shape: f32[8,128], index: 1, kind: output, shape index: {}]  }
   0x1   :  { %v74_v0 = vld [vmem:[%s92_s0] sm:$0x1] }
   0x2   :  { %v62_v1 = vmul.f32 %v74_v0, %v74_v0 }
   0x4   :  { %66 = vst [vmem:[%s93_s1] sm:$0xff] %v62_v1 }

</bundles_post_ra>
